<compile_context>
chip_gen: v5e
topology: v5e:2x2
jax: 0.10.0
libtpu: 0.0.40
codegen_flags: <defaults>
</compile_context>

<pallas_src>
import functools

import jax
import jax.numpy as jnp
from jax.experimental import pallas as pl
from jax.experimental.pallas import tpu as pltpu


def _pool_sum_kernel(v_ref, out_ref, acc_ref):
    """Streams one (1, rows, TP) video tile and accumulates lane-preserving sums."""
    k = pl.program_id(1)

    @pl.when(k == 0)
    def _init():
        acc_ref[...] = jnp.zeros_like(acc_ref)

    v = v_ref[0].astype(jnp.float32)            # (rows, TP), f32 accumulation
    tp = v.shape[-1]
    # Lane-preserving accumulation: fold TP -> 128 using only VPU adds on
    # 128-lane-aligned static slices (no per-tile cross-lane XLU reduce).
    partial = v[:, 0:128]
    for j in range(1, tp // 128):
        partial = partial + v[:, j * 128:(j + 1) * 128]
    acc_ref[...] += partial

    @pl.when(k == pl.num_programs(1) - 1)
    def _finalize():
        out_ref[0] = acc_ref[...]               # lane-dense (rows, 128) store


@functools.partial(jax.jit, static_argnames=("tp",))
def videonet_forward(video, wf, bf, wh_t, bh, *, tp=512):
    """video: (bs, n_clips, C, T, H, W) float32.  Returns (bs, out_dim) float32."""
    bs, n_clips, C, T, H, W = video.shape
    P = T * H * W
    R = n_clips * C                              # sublane-dense row count

    # Fold the two linears and the clip-average (all linear since dropout=0).
    w_fold = jnp.dot(wf, wh_t)                   # (C, out_dim)
    b_fold = jnp.dot(bf, wh_t) + bh              # (out_dim,)

    video_flat = video.reshape(bs, R, P)

    # Lane-aligned reduction tile over P; zero-pad P up to a multiple of the
    # tile (padding zeros do not change the sums; we divide by the true P).
    tp = max(128, (tp // 128) * 128)
    tp = min(tp, ((P + 127) // 128) * 128)
    p_pad = ((P + tp - 1) // tp) * tp
    if p_pad != P:
        video_flat = jnp.pad(video_flat, ((0, 0), (0, 0), (0, p_pad - P)))
    n_k = p_pad // tp

    # Explicit scoped-VMEM budget: 2x double-buffered input block + scratch +
    # output block, with headroom; safe on v5e/v6e/v7x.
    block_bytes = R * tp * video_flat.dtype.itemsize
    vmem_limit = int(min(max(4 * block_bytes + (4 << 20), 32 << 20), 48 << 20))

    acc = pl.pallas_call(
        _pool_sum_kernel,
        out_shape=jax.ShapeDtypeStruct((bs, R, 128), jnp.float32),
        grid_spec=pltpu.PrefetchScalarGridSpec(
            num_scalar_prefetch=0,
            grid=(bs, n_k),
            in_specs=[pl.BlockSpec((1, R, tp), lambda b, k: (b, 0, k))],
            out_specs=pl.BlockSpec((1, R, 128), lambda b, k: (b, 0, 0)),
            scratch_shapes=[pltpu.VMEM((R, 128), jnp.float32)],
        ),
        compiler_params=pltpu.CompilerParams(
            dimension_semantics=("parallel", "arbitrary"),
            vmem_limit_bytes=vmem_limit),
    )(video_flat)                                # (bs, R, 128) partial sums

    # Finish the tiny reduction + folded matvec in XLA.
    rowsum = acc.sum(-1)                                         # (bs, R)
    cmean = rowsum.reshape(bs, n_clips, C).sum(1) * (1.0 / (n_clips * P))
    return cmean @ w_fold + b_fold                               # (bs, out_dim)


def _reference(video, wf, bf, wh_t, bh):
    """Unfolded reference matching the PyTorch forward (validates the fold)."""
    bs, n_clips, C = video.shape[:3]
    v = video.reshape(bs * n_clips, C, -1)
    pool = v.mean(-1)
    feat = pool @ wf + bf
    logits = feat @ wh_t + bh
    return logits.reshape(bs, n_clips, -1).mean(1)


if __name__ == "__main__":
    # Small shapes consistent with the module's assumptions.
    bs, n_clips, C, T, H, W = 2, 3, 4, 8, 16, 16
    feat_dim, out_dim = 32, 10

    key = jax.random.PRNGKey(0)
    k_v, k_wf, k_bf, k_wh, k_bh = jax.random.split(key, 5)

    video = jax.random.normal(k_v, (bs, n_clips, C, T, H, W), dtype=jnp.float32)

    # Deterministic parameter init (synthetic, not a checkpoint).
    wf = jax.random.normal(k_wf, (C, feat_dim), dtype=jnp.float32) * 0.1
    bf = jax.random.normal(k_bf, (feat_dim,), dtype=jnp.float32) * 0.1
    # nn.Linear(feat_dim, out_dim): weight (out_dim, feat_dim); we pass W^T.
    wh = jax.random.normal(k_wh, (out_dim, feat_dim), dtype=jnp.float32) * 0.1
    bh = jax.random.normal(k_bh, (out_dim,), dtype=jnp.float32) * 0.1
    wh_t = wh.T

    out = videonet_forward(video, wf, bf, wh_t, bh)
    out = jax.block_until_ready(out)

    ref = _reference(video, wf, bf, wh_t, bh)
    assert out.shape == (bs, out_dim)
    assert jnp.allclose(out, ref, atol=1e-4, rtol=1e-4)

    print("KERNEL_OK")
</pallas_src>

<mosaic_0001>
module attributes {stable_mosaic.version = 11 : i64} {
  func.func @_pool_sum_kernel(%arg0: i32, %arg1: i32, %arg2: memref<1x12x512xf32, #tpu.memory_space<vmem>>, %arg3: memref<1x12x128xf32, #tpu.memory_space<vmem>>, %arg4: memref<12x128xf32, #tpu.memory_space<vmem>>) attributes {dimension_semantics = [#tpu.dimension_semantics<parallel>, #tpu.dimension_semantics<arbitrary>], iteration_bounds = array<i64: 2, 4>, scalar_prefetch = 0 : i64, scratch_operands = 1 : i64, tpu.core_type = #tpu.core_type<tc>, window_params = [{transform_indices = @transform_0, window_bounds = array<i64: 1, 12, 512>}, {transform_indices = @transform_1, window_bounds = array<i64: 1, 12, 128>}]} {
    %c0_i32 = arith.constant 0 : i32
    %0 = arith.cmpi eq, %arg1, %c0_i32 : i32
    %1 = arith.extui %0 : i1 to i32
    %c0_i32_0 = arith.constant 0 : i32
    %2 = arith.cmpi ne, %1, %c0_i32_0 : i32
    scf.if %2 {
      %cst = arith.constant 0.000000e+00 : f32
      %18 = vector.broadcast %cst : f32 to vector<12x128xf32>
      %c0_8 = arith.constant 0 : index
      %c0_9 = arith.constant 0 : index
      %19 = vector.load %arg4[%c0_8, %c0_9] : memref<12x128xf32, #tpu.memory_space<vmem>>, vector<12x128xf32>
      tpu.vector_store %arg4[%c0_8, %c0_9], %18 {strides = array<i32>} : memref<12x128xf32, #tpu.memory_space<vmem>>, vector<12x128xf32>,
    } else {
    }
    %c0 = arith.constant 0 : index
    %c0_1 = arith.constant 0 : index
    %c0_2 = arith.constant 0 : index
    %3 = vector.load %arg2[%c0, %c0_1, %c0_2] : memref<1x12x512xf32, #tpu.memory_space<vmem>>, vector<1x12x512xf32>
    %4 = vector.shape_cast %3 : vector<1x12x512xf32> to vector<12x512xf32>
    %5 = vector.extract_strided_slice %4 {offsets = [0, 0], sizes = [12, 128], strides = [1, 1]} : vector<12x512xf32> to vector<12x128xf32>
    %6 = vector.extract_strided_slice %4 {offsets = [0, 128], sizes = [12, 128], strides = [1, 1]} : vector<12x512xf32> to vector<12x128xf32>
    %7 = arith.addf %5, %6 : vector<12x128xf32>
    %8 = vector.extract_strided_slice %4 {offsets = [0, 256], sizes = [12, 128], strides = [1, 1]} : vector<12x512xf32> to vector<12x128xf32>
    %9 = arith.addf %7, %8 : vector<12x128xf32>
    %10 = vector.extract_strided_slice %4 {offsets = [0, 384], sizes = [12, 128], strides = [1, 1]} : vector<12x512xf32> to vector<12x128xf32>
    %11 = arith.addf %9, %10 : vector<12x128xf32>
    %c0_3 = arith.constant 0 : index
    %c0_4 = arith.constant 0 : index
    %12 = vector.load %arg4[%c0_3, %c0_4] : memref<12x128xf32, #tpu.memory_space<vmem>>, vector<12x128xf32>
    %13 = arith.addf %12, %11 : vector<12x128xf32>
    %c0_5 = arith.constant 0 : index
    %c0_6 = arith.constant 0 : index
    %14 = vector.load %arg4[%c0_5, %c0_6] : memref<12x128xf32, #tpu.memory_space<vmem>>, vector<12x128xf32>
    tpu.vector_store %arg4[%c0_5, %c0_6], %13 {strides = array<i32>} : memref<12x128xf32, #tpu.memory_space<vmem>>, vector<12x128xf32>,
    %c3_i32 = arith.constant 3 : i32
    %15 = arith.cmpi eq, %arg1, %c3_i32 : i32
    %16 = arith.extui %15 : i1 to i32
    %c0_i32_7 = arith.constant 0 : i32
    %17 = arith.cmpi ne, %16, %c0_i32_7 : i32
    scf.if %17 {
      %c0_8 = arith.constant 0 : index
      %c0_9 = arith.constant 0 : index
      %18 = vector.load %arg4[%c0_8, %c0_9] : memref<12x128xf32, #tpu.memory_space<vmem>>, vector<12x128xf32>
      %c0_10 = arith.constant 0 : index
      %c0_11 = arith.constant 0 : index
      %c0_12 = arith.constant 0 : index
      %19 = vector.load %arg3[%c0_10, %c0_11, %c0_12] : memref<1x12x128xf32, #tpu.memory_space<vmem>>, vector<1x12x128xf32>
      %20 = vector.shape_cast %19 : vector<1x12x128xf32> to vector<12x128xf32>
      %21 = vector.shape_cast %18 : vector<12x128xf32> to vector<1x12x128xf32>
      tpu.vector_store %arg3[%c0_10, %c0_11, %c0_12], %21 {strides = array<i32>} : memref<1x12x128xf32, #tpu.memory_space<vmem>>, vector<1x12x128xf32>,
    } else {
    }
    return
  }
  func.func @transform_0(%arg0: i32, %arg1: i32) -> (i32, i32, i32) {
    %c0_i32 = arith.constant 0 : i32
    %c0_i32_0 = arith.constant 0 : i32
    return %arg0, %c0_i32, %arg1 : i32, i32, i32
  }
  func.func @transform_1(%arg0: i32, %arg1: i32) -> (i32, i32, i32) {
    %c0_i32 = arith.constant 0 : i32
    %c0_i32_0 = arith.constant 0 : i32
    %c0_i32_1 = arith.constant 0 : i32
    return %arg0, %c0_i32, %c0_i32_0 : i32, i32, i32
  }
}

</mosaic_0001>

<bundles_post_ra>
// kernel: videonet_forward.1
= control target key start
LH: loop header
LB: loop body
LE: loop exit
PB: predicated region body
PF: predicated region fallthrough
CT: control target
= control target key end

     0   :  { %s418_s6 = smov 0   ;;  %s420_s7 = smov 0   ;;  %s513_s0 = inlined_call_operand.vmem [shape: f32[2,12,2048], index: 0, kind: input, shape index: {}]   ;;  %s514_s1 = inlined_call_operand.vmem [shape: f32[2,12,128], index: 1, kind: output, shape index: {}]  }
   0x1   :  { %s422_s8 = smov 0   ;;  %s424_s9 = smov 0  }
   0x2   :  { %s426_s10 = smov 0   ;;  %s428_s11 = smov 0  }
   0x3   :  { %s430_s12 = smov 0  }
   0x4 LB: > { %s20_s13 = sadd.s32 1, %s397_s10  ;;  %s23_s14 = sadd.s32 1, %s401_s11  ;;  %s405_s12 = sphi %s430_s12, %s11_s12   ;;  %s401_s11 = sphi %s428_s11, %s520_s11   ;;  %s397_s10 = sphi %s426_s10, %s519_s10   ;;  %s393_s9 = sphi %s424_s9, %s518_s9   ;;  %s389_s8 = sphi %s422_s8, %s517_s8   ;;  %s385_s7 = sphi %s420_s7, %s516_s7   ;;  %s381_s6 = sphi %s418_s6, %s515_s6  }
   0x5   : > { %p21_p0 = scmp.ge.s32.totalorder %s20_s13, 4  ;;  %p39_p1 = scmp.ne.s32.totalorder %s385_s7, %s381_s6 }
   0x6   : > { %p40_p2 = scmp.eq.s32.totalorder %s405_s12, 0  ;;  %s32_s18 = sadd.s32 1, %s385_s7 }
   0x7   : > { %s522_s13 = smov (%p21_p0, %s20_s13), 0  ;;  %s524_s14 = smov (!%p21_p0, %s23_s14), %s401_s11 }
   0x8   : > { %p41_p3 = por %p40_p2, %p39_p1  ;;  %p25_p4 = scmp.ge.s32.totalorder %s524_s14, 2 }
   0x9   : > { %s28_s15 = ssub.s32 %s397_s10, %s522_s13  ;;  %p280_p6 = scmp.ge.s32.totalorder %s405_s12, 8 }
   0xa   : > { %s526_s14 = smov (%p25_p4, %s524_s14), 0 }
   0xb   : > { %s27_s16 = ssub.s32 %s401_s11, %s526_s14  ;;  %91 = sbr.rel (%p280_p6) target bundleno = 31 (0x1f), region = 16 }
   0xc   : > { %s29_s17 = sor.u32 %s28_s15, %s27_s16 }
   0xd   : > { %p30_p5 = scmp.eq.s32.totalorder %s29_s17, 0 }
   0xf   : > { %s469_s19 = scalar_select %p30_p5, %s385_s7, %s32_s18  }
  0x10   : > { %94 = sbr.rel (!%p41_p3) target bundleno = 31 (0x1f), region = 20  ;;  %s96_s20 = sand.u32 (%p41_p3), 1, %s385_s7  }
  0x11   : > { %s282_s21 = sshll.u32 (%p41_p3), %s397_s10, 2  ;;  %s281_s22 = sshll.u32 (%p41_p3), %s96_s20, 6 }
  0x12   : > { %s283_s23 = sshll.u32 (%p41_p3), %s401_s11, 5  ;;  %s98_s29 = scalar_lea.vmem (%p41_p3), [#allocation3], %s281_s22 }
  0x13   : > { %s101_s24 = sadd.s32 (%p41_p3), %s283_s23, %s282_s21 }
  0x14   : > { %s284_s25 = sshll.u32 (%p41_p3), %s101_s24, 3 }
  0x15   : > { %s103_s28 = scalar_lea.vmem %s513_s0, %s284_s25 }
  0x16   : > { %v116_v0 = vld [vmem:[%s103_s28] sm:$0xff]  ;;  %v118_v1 = vld [vmem:[%s103_s28 + $0x8] sm:$0xff]  ;;  %v120_v2 = vld [vmem:[%s103_s28 + $0x10] sm:$0xff] }
  0x17   : > { %117 = vst [vmem:[%s98_s29] sm:$0xff] %v116_v0  ;;  %v122_v3 = vld [vmem:[%s103_s28 + $0x18] sm:$0xff]  ;;  %v124_v4 = vld [vmem:[%s103_s28 + $0x80] sm:$0xff]  ;;  %v126_v5 = vld [vmem:[%s103_s28 + $0x88] sm:$0xff] }
  0x18   : > { %119 = vst [vmem:[%s98_s29 + $0x8] sm:$0xff] %v118_v1  ;;  %v128_v6 = vld [vmem:[%s103_s28 + $0x90] sm:$0xff]  ;;  %v130_v7 = vld [vmem:[%s103_s28 + $0x98] sm:$0xff] }
  0x19   : > { %121 = vst [vmem:[%s98_s29 + $0x10] sm:$0xff] %v120_v2 }
  0x1a   : > { %123 = vst [vmem:[%s98_s29 + $0x18] sm:$0xff] %v122_v3 }
  0x1b   : > { %125 = vst [vmem:[%s98_s29 + $0x20] sm:$0xff] %v124_v4 }
  0x1c   : > { %127 = vst [vmem:[%s98_s29 + $0x28] sm:$0xff] %v126_v5 }
  0x1d   : > { %129 = vst [vmem:[%s98_s29 + $0x30] sm:$0xff] %v128_v6 }
  0x1e   : > { %131 = vst [vmem:[%s98_s29 + $0x38] sm:$0xff] %v130_v7 }
  0x1f PF: > { %p285_p7 = scmp.ge.s32.totalorder %s405_s12, 1  ;;  %p136_p8 = scmp.lt.s32.totalorder %s405_s12, 9 }
  0x21   : > { %p137_p9 = pnand %p285_p7, %p136_p8 }
  0x22   : > { %s143_s30 = sand.u32 (!%p137_p9), 1, %s381_s6   ;;  %p163_p10 = scmp.lt.s32.totalorder (!%p137_p9), %s393_s9, 1 }
  0x23   : > { %140 = sbr.rel (%p137_p9) target bundleno = 67 (0x43), region = 43  ;;  %s286_s2 = sshll.u32 (!%p137_p9), %s143_s30, 6 }
  0x24   : > { %s145_s16 = scalar_lea.vmem (!%p137_p9), [#allocation3], %s286_s2  ;;  %p289_p11 = scmp.ne.s32.totalorder (!%p137_p9), %s389_s8, 0 }
  0x28   : > { %s528_s9 = smov (!%p163_p10, %s393_s9), 1  ;;  %171 = sbr.rel (%p289_p11) target bundleno = 48 (0x30), region = 51 }
  0x29   : > { %s293_s3 = sshll.u32 %s528_s9, 4 }
  0x2a   : > { %s486_s15 = scalar_lea.vmem %s514_s1, %s293_s3 }
  0x2d   : > { %v407_v8 = vmov 0.0  }
  0x2e   : > { %172 = vst [vmem:[#allocation2] sm:$0xff] %v407_v8 }
  0x2f   : > { %173 = vst [vmem:[#allocation2 + $0x8] sm:$0xf] %v407_v8 }
  0x30 PF: > { %v174_v9 = vld [vmem:[%s145_s16] sm:$0xff]  ;;  %v175_v10 = vld [vmem:[%s145_s16 + $0x8] sm:$0xff]  ;;  %v176_v11 = vld [vmem:[%s145_s16 + $0x10] sm:$0xff]  ;;  %p290_p12 = scmp.ne.s32.totalorder %s389_s8, 3 }
  0x31   : > { %v182_v12 = vadd.f32 %v175_v10, %v174_v9  ;;  %v178_v13 = vld [vmem:[%s145_s16 + $0x20] sm:$0xf]  ;;  %v177_v14 = vld [vmem:[%s145_s16 + $0x18] sm:$0xff]  ;;  %v179_v15 = vld [vmem:[%s145_s16 + $0x28] sm:$0xf] }
  0x32   : > { %v180_v16 = vld [vmem:[%s145_s16 + $0x30] sm:$0xf]  ;;  %v183_v18 = vadd.f32 %v179_v15, %v178_v13  ;;  %v181_v20 = vld [vmem:[%s145_s16 + $0x38] sm:$0xf] }
  0x33   : > { %v184_v17 = vadd.f32 %v182_v12, %v176_v11 }
  0x34   : > { %v185_v22 = vadd.f32 %v183_v18, %v180_v16 }
  0x35   : > { %v188_v19 = vld [vmem:[#allocation2] sm:$0xff]  ;;  %v186_v21 = vadd.f32 %v184_v17, %v177_v14 }
  0x36   : > { %v189_v23 = vld [vmem:[#allocation2 + $0x8] sm:$0xf]  ;;  %v187_v25 = vadd.f32 %v185_v22, %v181_v20  ;;  %197 = sbr.rel (%p290_p12) target bundleno = 67 (0x43), region = 55 }
  0x37   : > { %v190_v24 = vadd.f32 %v188_v19, %v186_v21 }
  0x38   : > { %v191_v26 = vadd.f32 %v189_v23, %v187_v25 }
  0x39   : > { %192 = vst [vmem:[#allocation2] sm:$0xff] %v190_v24 }
  0x3a   : > { %193 = vst [vmem:[#allocation2 + $0x8] sm:$0xf] %v191_v26 }
  0x40   : > { %v198_v27 = vld [vmem:[#allocation2] sm:$0xff] }
  0x41   : > { %v199_v28 = vld [vmem:[#allocation2 + $0x8] sm:$0xf]  ;;  %200 = vst [vmem:[%s486_s15] sm:$0xff] %v198_v27 }
  0x42   : > { %201 = vst [vmem:[%s486_s15 + $0x8] sm:$0xf] %v199_v28 }
  0x43 PF: > { %s11_s12 = sadd.s32 1, %s405_s12   ;;  %s515_s6 = smov %s385_s7 }
  0x44   : > { %p8_p13 = scmp.ge.s32.totalorder %s11_s12, 10   ;;  %s516_s7 = smov %s469_s19 }
  0x45   : > { %s517_s8 = smov %s397_s10  ;;  %s518_s9 = smov %s401_s11 }
  0x46   : > { %s519_s10 = smov %s522_s13  ;;  %s520_s11 = smov %s526_s14 }
  0x47   :  { %10 = sbr.rel (!%p8_p13) target bundleno = 4 (0x4), region = 90 }

</bundles_post_ra>
